<compile_context>
chip_gen: v5e
topology: v5e:2x2
jax: 0.10.0
libtpu: 0.0.40
codegen_flags: <defaults>
</compile_context>

<pallas_src>
import jax
import jax.numpy as jnp
import numpy as np
from jax.experimental import pallas as pl
from jax.experimental.pallas import tpu as pltpu


def embed_kernel(x_ref, w1e_ref, b1e_ref, w2_ref, o_ref):
    # x_ref:   (J, tm, C)   channels-last rows for this grid step
    # w1e_ref: (J, C, H)    BN-scale folded first-conv weights (per joint)
    # b1e_ref: (J, 1, H)    BN-shift folded first-conv bias    (per joint)
    # w2_ref:  (H, D1)      second-conv weights (shared across steps)
    # o_ref:   (J, tm, D1)
    x = x_ref[...]
    w1e = w1e_ref[...]
    J, tm, C = x.shape
    H = w1e.shape[-1]
    D1 = o_ref.shape[-1]

    # First projection, K = C (tiny): VPU broadcast-FMAs, fully unrolled.
    # BatchNorm (eval) is already folded into w1e / b1e.
    h = b1e_ref[...] + x[:, :, 0:1] * w1e[:, 0:1, :]
    for c in range(1, C):                       # static unroll (C == 3)
        h = h + x[:, :, c:c + 1] * w1e[:, c:c + 1, :]
    h = jnp.maximum(h, 0.0)                     # ReLU

    # Second projection, K = H = 64: MXU matmul on the flattened rows.
    o = jnp.dot(h.reshape(J * tm, H), w2_ref[...],
                preferred_element_type=jnp.float32)
    o_ref[...] = jnp.maximum(o, 0.0).reshape(J, tm, D1).astype(o_ref.dtype)


def embed_forward(x, bn_gamma, bn_beta, bn_mean, bn_var, w1, w2, *, eps=1e-5):
    """x: (B, C, J, T) float32.  Returns (B, D1, J, T) like the PyTorch module."""
    B, C, J, T = x.shape
    H = w1.shape[1]
    D1 = w2.shape[1]
    BT = B * T

    # --- fold BatchNorm1d(C*J) (eval, running stats) into per-joint weights ---
    # TODO(synk): training-mode BatchNorm (batch statistics) is not implemented;
    #             eval-mode running-stat semantics only.
    inv_std = 1.0 / jnp.sqrt(bn_var + eps)
    scale_cj = (bn_gamma * inv_std).reshape(C, J)                       # (C, J)
    shift_cj = (bn_beta - bn_mean * bn_gamma * inv_std).reshape(C, J)   # (C, J)
    w1_eff = scale_cj.T[:, :, None] * w1[None, :, :]                    # (J, C, H)
    b1_eff = (shift_cj.T @ w1)[:, None, :]                              # (J, 1, H)

    # joint-major, channels-last rows: (B, C, J, T) -> (J, B*T, C)
    xj = jnp.transpose(x, (2, 0, 3, 1)).reshape(J, BT, C)

    # Row tile: a multiple of 8 that divides B*T (no padding / tail masking),
    # >= 2 grid steps when possible so both v7x TensorCores get work
    # (a single step is fine on v5e/v6e), capped so the lane-padded
    # (J, tm, C) / (J, tm, D1) blocks stay well inside default scoped VMEM.
    if BT % 16 == 0:
        tm = BT // 2
        while tm > 128 and tm % 16 == 0:
            tm //= 2
    else:
        tm = BT                    # full-extent row block (always legal)
    n_steps = BT // tm

    out = pl.pallas_call(
        embed_kernel,
        out_shape=jax.ShapeDtypeStruct((J, BT, D1), jnp.float32),
        grid_spec=pltpu.PrefetchScalarGridSpec(
            num_scalar_prefetch=0,
            grid=(n_steps,),
            in_specs=[
                pl.BlockSpec((J, tm, C), lambda i: (0, i, 0)),   # x rows
                pl.BlockSpec((J, C, H), lambda i: (0, 0, 0)),    # w1_eff (resident)
                pl.BlockSpec((J, 1, H), lambda i: (0, 0, 0)),    # b1_eff (resident)
                pl.BlockSpec((H, D1), lambda i: (0, 0)),         # w2     (resident)
            ],
            out_specs=pl.BlockSpec((J, tm, D1), lambda i: (0, i, 0)),
        ),
        compiler_params=pltpu.CompilerParams(
            dimension_semantics=("parallel",)),
    )(xj, w1_eff, b1_eff, w2)

    # (J, B*T, D1) -> (B, D1, J, T): single transpose, no pad/slice copies.
    return jnp.transpose(out.reshape(J, B, T, D1), (1, 3, 0, 2))


def embed_reference(x, bn_gamma, bn_beta, bn_mean, bn_var, w1, w2, eps=1e-5):
    B, C, J, T = x.shape
    xf = x.reshape(B, C * J, T)
    xn = (xf - bn_mean[None, :, None]) / jnp.sqrt(bn_var[None, :, None] + eps)
    xn = xn * bn_gamma[None, :, None] + bn_beta[None, :, None]
    xn = xn.reshape(B, C, J, T)
    # First projection at 'highest' precision (exact f32, like PyTorch fp32);
    # second at default precision, mirroring the kernel's MXU dot.
    h = jnp.einsum('bcjt,ck->bkjt', xn, w1, precision='highest')
    h = jnp.maximum(h, 0.0)
    o = jnp.einsum('bkjt,kd->bdjt', h, w2)
    return jnp.maximum(o, 0.0)


if __name__ == "__main__":
    # module defaults: dim=3, dim1=128, norm=True, bias=False, num_joints=25
    B, C, J, T = 2, 3, 25, 8
    HID, D1 = 64, 128

    key = jax.random.PRNGKey(0)
    kx, k1, k2, kg, kb, km, kv = jax.random.split(key, 7)

    x = jax.random.normal(kx, (B, C, J, T), dtype=jnp.float32)

    # deterministic synthetic params (Conv2d 1x1 weights -> (in, out) matrices, no bias)
    w1 = jax.random.normal(k1, (C, HID), dtype=jnp.float32) / np.sqrt(C)
    w2 = jax.random.normal(k2, (HID, D1), dtype=jnp.float32) / np.sqrt(HID)

    # BatchNorm1d(C*J) params, eval-mode running stats
    bn_gamma = 1.0 + 0.01 * jnp.arange(C * J, dtype=jnp.float32)
    bn_beta = 0.05 * jax.random.normal(kb, (C * J,), dtype=jnp.float32)
    bn_mean = 0.1 * jax.random.normal(km, (C * J,), dtype=jnp.float32)
    bn_var = 1.0 + 0.1 * jax.random.uniform(kv, (C * J,), dtype=jnp.float32)

    out = embed_forward(x, bn_gamma, bn_beta, bn_mean, bn_var, w1, w2)
    out = jax.block_until_ready(out)

    ref = embed_reference(x, bn_gamma, bn_beta, bn_mean, bn_var, w1, w2)
    assert out.shape == (B, D1, J, T), out.shape
    # Tolerance sized to cover MXU-f32 vs XLA-f32 matmul rounding differences;
    # any structural bug (BN fold / indexing / transpose) would be O(0.1+).
    np.testing.assert_allclose(np.asarray(out), np.asarray(ref), rtol=5e-3, atol=5e-3)
    print("KERNEL_OK")
</pallas_src>

<mosaic_0001>
module attributes {stable_mosaic.version = 11 : i64} {
  func.func @embed_kernel(%arg0: i32, %arg1: memref<25x8x3xf32, #tpu.memory_space<vmem>>, %arg2: memref<25x3x64xf32, #tpu.memory_space<vmem>>, %arg3: memref<25x1x64xf32, #tpu.memory_space<vmem>>, %arg4: memref<64x128xf32, #tpu.memory_space<vmem>>, %arg5: memref<25x8x128xf32, #tpu.memory_space<vmem>>) attributes {dimension_semantics = [#tpu.dimension_semantics<parallel>], iteration_bounds = array<i64: 2>, scalar_prefetch = 0 : i64, scratch_operands = 0 : i64, tpu.core_type = #tpu.core_type<tc>, window_params = [{transform_indices = @transform_0, window_bounds = array<i64: 25, 8, 3>}, {pipeline_mode = #tpu.pipeline_mode<synchronous>, transform_indices = @transform_1, window_bounds = array<i64: 25, 3, 64>}, {pipeline_mode = #tpu.pipeline_mode<synchronous>, transform_indices = @transform_2, window_bounds = array<i64: 25, 1, 64>}, {pipeline_mode = #tpu.pipeline_mode<synchronous>, transform_indices = @transform_3, window_bounds = array<i64: 64, 128>}, {transform_indices = @transform_4, window_bounds = array<i64: 25, 8, 128>}]} {
    %c0 = arith.constant 0 : index
    %c0_0 = arith.constant 0 : index
    %c0_1 = arith.constant 0 : index
    %0 = vector.load %arg1[%c0, %c0_0, %c0_1] : memref<25x8x3xf32, #tpu.memory_space<vmem>>, vector<25x8x3xf32>
    %c0_2 = arith.constant 0 : index
    %c0_3 = arith.constant 0 : index
    %c0_4 = arith.constant 0 : index
    %1 = vector.load %arg2[%c0_2, %c0_3, %c0_4] : memref<25x3x64xf32, #tpu.memory_space<vmem>>, vector<25x3x64xf32>
    %c0_5 = arith.constant 0 : index
    %c0_6 = arith.constant 0 : index
    %c0_7 = arith.constant 0 : index
    %2 = vector.load %arg3[%c0_5, %c0_6, %c0_7] : memref<25x1x64xf32, #tpu.memory_space<vmem>>, vector<25x1x64xf32>
    %3 = vector.extract_strided_slice %0 {offsets = [0, 0, 0], sizes = [25, 8, 1], strides = [1, 1, 1]} : vector<25x8x3xf32> to vector<25x8x1xf32>
    %4 = vector.extract_strided_slice %1 {offsets = [0, 0, 0], sizes = [25, 1, 64], strides = [1, 1, 1]} : vector<25x3x64xf32> to vector<25x1x64xf32>
    %5 = vector.broadcast %3 : vector<25x8x1xf32> to vector<25x8x64xf32>
    %6 = vector.broadcast %4 : vector<25x1x64xf32> to vector<25x8x64xf32>
    %7 = arith.mulf %5, %6 : vector<25x8x64xf32>
    %8 = vector.broadcast %2 : vector<25x1x64xf32> to vector<25x8x64xf32>
    %9 = arith.addf %8, %7 : vector<25x8x64xf32>
    %10 = vector.extract_strided_slice %0 {offsets = [0, 0, 1], sizes = [25, 8, 1], strides = [1, 1, 1]} : vector<25x8x3xf32> to vector<25x8x1xf32>
    %11 = vector.extract_strided_slice %1 {offsets = [0, 1, 0], sizes = [25, 1, 64], strides = [1, 1, 1]} : vector<25x3x64xf32> to vector<25x1x64xf32>
    %12 = vector.broadcast %10 : vector<25x8x1xf32> to vector<25x8x64xf32>
    %13 = vector.broadcast %11 : vector<25x1x64xf32> to vector<25x8x64xf32>
    %14 = arith.mulf %12, %13 : vector<25x8x64xf32>
    %15 = arith.addf %9, %14 : vector<25x8x64xf32>
    %16 = vector.extract_strided_slice %0 {offsets = [0, 0, 2], sizes = [25, 8, 1], strides = [1, 1, 1]} : vector<25x8x3xf32> to vector<25x8x1xf32>
    %17 = vector.extract_strided_slice %1 {offsets = [0, 2, 0], sizes = [25, 1, 64], strides = [1, 1, 1]} : vector<25x3x64xf32> to vector<25x1x64xf32>
    %18 = vector.broadcast %16 : vector<25x8x1xf32> to vector<25x8x64xf32>
    %19 = vector.broadcast %17 : vector<25x1x64xf32> to vector<25x8x64xf32>
    %20 = arith.mulf %18, %19 : vector<25x8x64xf32>
    %21 = arith.addf %15, %20 : vector<25x8x64xf32>
    %cst = arith.constant 0.000000e+00 : f32
    %22 = vector.broadcast %cst : f32 to vector<25x8x64xf32>
    %23 = arith.maximumf %21, %22 : vector<25x8x64xf32>
    %24 = vector.shape_cast %23 : vector<25x8x64xf32> to vector<200x64xf32>
    %c0_8 = arith.constant 0 : index
    %c0_9 = arith.constant 0 : index
    %25 = vector.load %arg4[%c0_8, %c0_9] : memref<64x128xf32, #tpu.memory_space<vmem>>, vector<64x128xf32>
    %cst_10 = arith.constant dense<0.000000e+00> : vector<200x128xf32>
    %26 = tpu.matmul %24, %25, %cst_10 {dimension_numbers = #tpu.dot_dimension_numbers<[1], [0], [0], [1], [0, 0, 1, 1], [], []>} : vector<200x64xf32>, vector<64x128xf32>, vector<200x128xf32> -> vector<200x128xf32>
    %cst_11 = arith.constant 0.000000e+00 : f32
    %27 = vector.broadcast %cst_11 : f32 to vector<200x128xf32>
    %28 = arith.maximumf %26, %27 : vector<200x128xf32>
    %29 = vector.shape_cast %28 : vector<200x128xf32> to vector<25x8x128xf32>
    %c0_12 = arith.constant 0 : index
    %c0_13 = arith.constant 0 : index
    %c0_14 = arith.constant 0 : index
    %30 = vector.load %arg5[%c0_12, %c0_13, %c0_14] : memref<25x8x128xf32, #tpu.memory_space<vmem>>, vector<25x8x128xf32>
    tpu.vector_store %arg5[%c0_12, %c0_13, %c0_14], %29 {strides = array<i32>} : memref<25x8x128xf32, #tpu.memory_space<vmem>>, vector<25x8x128xf32>,
    return
  }
  func.func @transform_0(%arg0: i32) -> (i32, i32, i32) {
    %c0_i32 = arith.constant 0 : i32
    %c0_i32_0 = arith.constant 0 : i32
    %c0_i32_1 = arith.constant 0 : i32
    return %c0_i32, %arg0, %c0_i32_0 : i32, i32, i32
  }
  func.func @transform_1(%arg0: i32) -> (i32, i32, i32) {
    %c0_i32 = arith.constant 0 : i32
    %c0_i32_0 = arith.constant 0 : i32
    %c0_i32_1 = arith.constant 0 : i32
    %c0_i32_2 = arith.constant 0 : i32
    return %c0_i32, %c0_i32_0, %c0_i32_1 : i32, i32, i32
  }
  func.func @transform_2(%arg0: i32) -> (i32, i32, i32) {
    %c0_i32 = arith.constant 0 : i32
    %c0_i32_0 = arith.constant 0 : i32
    %c0_i32_1 = arith.constant 0 : i32
    %c0_i32_2 = arith.constant 0 : i32
    return %c0_i32, %c0_i32_0, %c0_i32_1 : i32, i32, i32
  }
  func.func @transform_3(%arg0: i32) -> (i32, i32) {
    %c0_i32 = arith.constant 0 : i32
    %c0_i32_0 = arith.constant 0 : i32
    %c0_i32_1 = arith.constant 0 : i32
    return %c0_i32, %c0_i32_0 : i32, i32
  }
  func.func @transform_4(%arg0: i32) -> (i32, i32, i32) {
    %c0_i32 = arith.constant 0 : i32
    %c0_i32_0 = arith.constant 0 : i32
    %c0_i32_1 = arith.constant 0 : i32
    return %c0_i32, %arg0, %c0_i32_0 : i32, i32, i32
  }
}

</mosaic_0001>

<bundles_post_ra>
// kernel: tpu_custom_call.1
= control target key start
LH: loop header
LB: loop body
LE: loop exit
PB: predicated region body
PF: predicated region fallthrough
CT: control target
= control target key end

     0   :  { %9 = vsyncpa [#allocation4], 0  ;;  %s2314_s0 = inlined_call_operand.vmem [shape: f32[25,16,3], index: 0, kind: input, shape index: {}]   ;;  %s2315_s1 = inlined_call_operand.vmem [shape: f32[25,3,64], index: 1, kind: input, shape index: {}]   ;;  %s2316_s2 = inlined_call_operand.vmem [shape: f32[25,1,64], index: 2, kind: input, shape index: {}]   ;;  %s2317_s3 = inlined_call_operand.vmem [shape: f32[64,128], index: 3, kind: input, shape index: {}]   ;;  %s2318_s4 = inlined_call_operand.hbm [shape: f32[25,16,128], index: 4, kind: output, shape index: {}]  }
   0x1   :  { %11 = vsyncpa [#allocation4 + $0x1], 0  ;;  %s1609_s15 = smov 0   ;;  %s1611_s16 = smov 0  }
   0x2   :  { %s1613_s17 = smov 0   ;;  %s1615_s18 = smov 0  }
   0x3 LB: > { %s1360_s19 = sadd.s32 4294967295, %s1576_s18   ;;  %s1361_s20 = sadd.s32 4294967294, %s1576_s18   ;;  %s1576_s18 = sphi %s1615_s18, %s2324_s18   ;;  %s1572_s17 = sphi %s1613_s17, %s2323_s17   ;;  %s1568_s16 = sphi %s1611_s16, %s2322_s16   ;;  %s1564_s15 = sphi %s1609_s15, %s2321_s15  }
   0x4   : > { %s1632_s21 = sadd.s32 1, %s1576_s18   ;;  %s24_s22 = sadd.s32 1, %s1572_s17 }
   0x5   : > { %s21_s23 = ssub.s32 %s1576_s18, %s1632_s21  ;;  %p31_p0 = scmp.ne.s32.totalorder %s1572_s17, %s1568_s16 }
   0x6   : > { %p22_p1 = scmp.eq.s32.totalorder %s21_s23, 0  ;;  %p32_p2 = scmp.eq.s32.totalorder %s1576_s18, 0 }
   0x7   : > { %p124_p3 = scmp.eq.s32.totalorder %s1360_s19, 1  ;;  %p129_p4 = scmp.ne.s32.totalorder %s1568_s16, %s1564_s15 }
   0x8   : > { %s1645_s24 = scalar_select %p22_p1, %s1572_s17, %s24_s22  }
   0x9   : > { %p33_p5 = por %p32_p2, %p31_p0  ;;  %p1647_p6 = por %p124_p3, %p31_p0 }
   0xa   : > { %p130_p7 = scmp.eq.s32.totalorder %s1361_s20, 1  ;;  %p1363_p9 = scmp.ge.s32.totalorder %s1576_s18, 2 }
   0xc   : > { %p1651_p8 = por %p130_p7, %p129_p4  ;;  %155 = sbr.rel (%p1363_p9) target bundleno = 46 (0x2e), region = 28 }
  0x11   : > { %158 = sbr.rel (!%p33_p5) target bundleno = 46 (0x2e), region = 32  ;;  %s160_s27 = sand.u32 (%p33_p5), 1, %s1572_s17  }
  0x12   : > { %s1364_s28 = sshll.u32 (%p33_p5), %s1576_s18, 3  ;;  %s1418_s29 = smul.u32 (%p33_p5), 200, %s160_s27 }
  0x13   : > { %s1663_s6 = scalar_lea.vmem (%p33_p5), %s2314_s0, %s1364_s28 }
  0x14   : > { %v241_v0 = vld [vmem:[%s1663_s6] sm:$0xff] (%p33_p5)  ;;  %v243_v1 = vld [vmem:[%s1663_s6 + $0x10] sm:$0xff] (%p33_p5)  ;;  %s1668_s7 = scalar_lea.vmem (%p33_p5), [#allocation2], %s1418_s29 }
  0x15   : > { %v245_v2 = vld [vmem:[%s1663_s6 + $0x20] sm:$0xff] (%p33_p5)  ;;  %242 = vst [vmem:[%s1668_s7] sm:$0xff] (%p33_p5), %v241_v0  ;;  %v247_v3 = vld [vmem:[%s1663_s6 + $0x30] sm:$0xff] (%p33_p5) }
  0x16   : > { %244 = vst [vmem:[%s1668_s7 + $0x8] sm:$0xff] %v243_v1  ;;  %v249_v4 = vld [vmem:[%s1663_s6 + $0x40] sm:$0xff]  ;;  %v251_v5 = vld [vmem:[%s1663_s6 + $0x50] sm:$0xff] }
  0x17   : > { %246 = vst [vmem:[%s1668_s7 + $0x10] sm:$0xff] %v245_v2  ;;  %v253_v6 = vld [vmem:[%s1663_s6 + $0x60] sm:$0xff]  ;;  %v255_v7 = vld [vmem:[%s1663_s6 + $0x70] sm:$0xff] }
  0x18   : > { %248 = vst [vmem:[%s1668_s7 + $0x18] sm:$0xff] %v247_v3  ;;  %v257_v8 = vld [vmem:[%s1663_s6 + $0x80] sm:$0xff]  ;;  %v259_v9 = vld [vmem:[%s1663_s6 + $0x90] sm:$0xff] }
  0x19   : > { %250 = vst [vmem:[%s1668_s7 + $0x20] sm:$0xff] %v249_v4  ;;  %v261_v10 = vld [vmem:[%s1663_s6 + $0xa0] sm:$0xff]  ;;  %v263_v11 = vld [vmem:[%s1663_s6 + $0xb0] sm:$0xff] }
  0x1a   : > { %252 = vst [vmem:[%s1668_s7 + $0x28] sm:$0xff] %v251_v5  ;;  %v265_v12 = vld [vmem:[%s1663_s6 + $0xc0] sm:$0xff]  ;;  %v267_v13 = vld [vmem:[%s1663_s6 + $0xd0] sm:$0xff] }
  0x1b   : > { %254 = vst [vmem:[%s1668_s7 + $0x30] sm:$0xff] %v253_v6  ;;  %v269_v14 = vld [vmem:[%s1663_s6 + $0xe0] sm:$0xff]  ;;  %v271_v15 = vld [vmem:[%s1663_s6 + $0xf0] sm:$0xff] }
  0x1c   : > { %256 = vst [vmem:[%s1668_s7 + $0x38] sm:$0xff] %v255_v7  ;;  %v273_v16 = vld [vmem:[%s1663_s6 + $0x100] sm:$0xff]  ;;  %v275_v17 = vld [vmem:[%s1663_s6 + $0x110] sm:$0xff] }
  0x1d   : > { %258 = vst [vmem:[%s1668_s7 + $0x40] sm:$0xff] %v257_v8  ;;  %v277_v18 = vld [vmem:[%s1663_s6 + $0x120] sm:$0xff]  ;;  %v279_v19 = vld [vmem:[%s1663_s6 + $0x130] sm:$0xff] }
  0x1e   : > { %260 = vst [vmem:[%s1668_s7 + $0x48] sm:$0xff] %v259_v9  ;;  %v281_v20 = vld [vmem:[%s1663_s6 + $0x140] sm:$0xff]  ;;  %v283_v21 = vld [vmem:[%s1663_s6 + $0x150] sm:$0xff] }
  0x1f   : > { %262 = vst [vmem:[%s1668_s7 + $0x50] sm:$0xff] %v261_v10  ;;  %v285_v22 = vld [vmem:[%s1663_s6 + $0x160] sm:$0xff]  ;;  %v287_v23 = vld [vmem:[%s1663_s6 + $0x170] sm:$0xff] }
  0x20   : > { %264 = vst [vmem:[%s1668_s7 + $0x58] sm:$0xff] %v263_v11  ;;  %v289_v24 = vld [vmem:[%s1663_s6 + $0x180] sm:$0xff] }
  0x21   : > { %266 = vst [vmem:[%s1668_s7 + $0x60] sm:$0xff] %v265_v12 }
  0x22   : > { %268 = vst [vmem:[%s1668_s7 + $0x68] sm:$0xff] %v267_v13 }
  0x23   : > { %270 = vst [vmem:[%s1668_s7 + $0x70] sm:$0xff] %v269_v14 }
  0x24   : > { %272 = vst [vmem:[%s1668_s7 + $0x78] sm:$0xff] %v271_v15 }
  0x25   : > { %274 = vst [vmem:[%s1668_s7 + $0x80] sm:$0xff] %v273_v16 }
  0x26   : > { %276 = vst [vmem:[%s1668_s7 + $0x88] sm:$0xff] %v275_v17 }
  0x27   : > { %278 = vst [vmem:[%s1668_s7 + $0x90] sm:$0xff] %v277_v18 }
  0x28   : > { %280 = vst [vmem:[%s1668_s7 + $0x98] sm:$0xff] %v279_v19 }
  0x29   : > { %282 = vst [vmem:[%s1668_s7 + $0xa0] sm:$0xff] %v281_v20 }
  0x2a   : > { %284 = vst [vmem:[%s1668_s7 + $0xa8] sm:$0xff] %v283_v21 }
  0x2b   : > { %286 = vst [vmem:[%s1668_s7 + $0xb0] sm:$0xff] %v285_v22 }
  0x2c   : > { %288 = vst [vmem:[%s1668_s7 + $0xb8] sm:$0xff] %v287_v23 }
  0x2d   : > { %290 = vst [vmem:[%s1668_s7 + $0xc0] sm:$0xff] %v289_v24 }
  0x2e PF: > { %p1365_p10 = scmp.ge.s32.totalorder %s1576_s18, 1  ;;  %p295_p11 = scmp.lt.s32.totalorder %s1576_s18, 3 }
  0x30   : > { %p296_p12 = pnand %p1365_p10, %p295_p11 }
  0x31   : > { %s302_s8 = sand.u32 (!%p296_p12), 1, %s1568_s16   ;;  %s1534_s23 = scalar_lea.hbm (!%p296_p12), %s2318_s4, 400 }
  0x32   : > { %299 = sbr.rel (%p296_p12) target bundleno = 531 (0x213), region = 70 }
  0x33   : > { %s1722_s9 = smul.u32 (!%p296_p12), 200, %s302_s8 }
  0x35   : > { %s1725_s10 = scalar_lea.vmem (!%p296_p12), [#allocation2], %s1722_s9  ;;  %s2242_s5 = scalar_lea.vmem (!%p296_p12), [#allocation3], %s1722_s9 }
  0x36   : > { %s1391_s9 = sshll.u32 (!%p296_p12), %s1360_s19, 3  ;;  %s1290_s11 = sshll.u32 (!%p296_p12), %s2242_s5, 4  ;;  %s1291_s11 = int_to_ptr.vmem [resolvable:$true] %s1290_s11 }
  0x37   : > { %v1578_v25 = vmov 0   ;;  %v1728_v26 = vld [vmem:[%s1725_s10 + $0x20] sm:$0xff]  ;;  %v1731_v27 = vld [vmem:[%s1725_s10 + $0x10] sm:$0xff]  ;;  %v1740_v29 = vld [vmem:[%s1725_s10 + $0x28] sm:$0xff]  ;;  %v1579_v51 = vmov 1   ;;  %v1580_v52 = vmov 2  }
  0x38   : > { %1467 = vset.pattern.permute.xlu2 %v1578_v25  ;;  %1466 = vset.pattern.permute.xlu1 %v1578_v25  ;;  %v1734_v28 = vld [vmem:[%s1725_s10] sm:$0xff]  ;;  %v1743_v30 = vld [vmem:[%s1725_s10 + $0x18] sm:$0xff]  ;;  %v1746_v31 = vld [vmem:[%s1725_s10 + $0x8] sm:$0xff]  ;;  %vm1060_vm0 = vcmask 523264   ;;  %s1279_s19 = scalar_lea.sflag [#allocation4], %s302_s8 }
  0x39   : > { %1465 = vset.pattern.permute.xlu0 %v1578_v25  ;;  %424 = vperm.xlu2 %1467, %v1728_v26   ;;  %v1752_v32 = vld [vmem:[%s1725_s10 + $0x40] sm:$0xff]  ;;  %v1755_v33 = vld [vmem:[%s1725_s10 + $0x38] sm:$0xff]  ;;  %v1758_v34 = vld [vmem:[%s1725_s10 + $0x30] sm:$0xff] }
  0x3a   : > { %414 = vperm.xlu1 %1466, %v1731_v27   ;;  %404 = vperm.xlu0 %1465, %v1734_v28   ;;  %v1764_v35 = vld [vmem:[%s1725_s10 + $0x58] sm:$0xff]  ;;  %v1767_v36 = vld [vmem:[%s1725_s10 + $0x50] sm:$0xff]  ;;  %v1770_v37 = vld [vmem:[%s1725_s10 + $0x48] sm:$0xff] }
  0x3b   : > { %v1776_v38 = vld [vmem:[%s1725_s10 + $0x70] sm:$0xff]  ;;  %v340_v39 = vld [vmem:[%s1725_s10 + $0x68] sm:$0xff]  ;;  %v339_v40 = vld [vmem:[%s1725_s10 + $0x60] sm:$0xff] }
  0x3c   : > { %v1782_v41 = vld [vmem:[%s1725_s10 + $0x88] sm:$0xff]  ;;  %v1785_v42 = vld [vmem:[%s1725_s10 + $0x80] sm:$0xff]  ;;  %v1788_v43 = vld [vmem:[%s1725_s10 + $0x78] sm:$0xff] }
  0x3d   : > { %v347_v44 = vld [vmem:[%s1725_s10 + $0xa0] sm:$0xff]  ;;  %v346_v45 = vld [vmem:[%s1725_s10 + $0x98] sm:$0xff]  ;;  %v1796_v46 = vld [vmem:[%s1725_s10 + $0x90] sm:$0xff] }
  0x3e   : > { %v1800_v47 = vld [vmem:[%s1725_s10 + $0xb8] sm:$0xff]  ;;  %v1803_v48 = vld [vmem:[%s1725_s10 + $0xb0] sm:$0xff]  ;;  %v1806_v49 = vld [vmem:[%s1725_s10 + $0xa8] sm:$0xff] }
  0x3f   : > { %v1812_v50 = vld [vmem:[%s1725_s10 + $0xc0] sm:$0xff]  ;;  %v1059_v9 = vld [vmem:[%s2317_s3 + $0x38] sm:$0xff]  ;;  %v1058_v12 = vld [vmem:[%s2317_s3 + $0x30] sm:$0xff]  ;;  %s1289_s10 = scalar_lea.hbm %s2318_s4, %s1391_s9 }
  0x40   : > { %v1878_v4 = vld [vmem:[%s2315_s1 + $0x4] sm:$0x7]  ;;  %v1497_v10 = vld [vmem:[%s2316_s2 + $0x1] ss:$0 sm:$0xff]  ;;  %1395 = vmatpush.msra.mxu2 %v1059_v9  ;;  %1396 = vmatpush.msra.mxu3 %v1059_v9  ;;  %v1057_v14 = vld [vmem:[%s2317_s3 + $0x28] sm:$0xff]  ;;  %s2279_s12 = sshll.u32 %s1289_s10, 4  ;;  %s1293_s12 = int_to_ptr.hbm [resolvable:$true] %s2279_s12 }
  0x41   : > { %429 = vperm.xlu2 %1467, %v1740_v29   ;;  %v528_v5 = vperm.slane %v1878_v4, 0  ;;  %v778_v13 = vperm.slane %v1878_v4, 1  ;;  %1144 = vmatpush.msra.mxu0 %v1059_v9  ;;  %v1908_v15 = vld [vmem:[%s2315_s1 + $0x10] sm:$0x7]  ;;  %v1056_v18 = vld [vmem:[%s2317_s3 + $0x20] sm:$0xff]  ;;  %v1055_v23 = vld [vmem:[%s2317_s3 + $0x18] sm:$0xff] }
  0x42   : > { %419 = vperm.xlu1 %1466, %v1743_v30   ;;  %409 = vperm.xlu0 %1465, %v1746_v31   ;;  %v531_v21 = vperm.slane %v1908_v15, 0  ;;  %v1054_v25 = vld [vmem:[%s2317_s3 + $0x10] sm:$0xff]  ;;  %s1528_s13 = sshra.s32 %s1293_s12, 4  ;;  %s1529_s13 = int_to_ptr.hbm [resolvable:$true] %s1528_s13 }
  0x43   : > { %1398 = vmatpush.msra.mxu2 %v1058_v12  ;;  %1399 = vmatpush.msra.mxu3 %v1058_v12  ;;  %s1530_s14 = scalar_lea.hbm %s1529_s13, 200  ;;  %p1535_p2 = scmp.lt.s32.totalorder %s1529_s13, %s2318_s4 }
  0x44   : > { %1394 = vmatpush.msra.mxu1 %v1059_v9  ;;  %1145 = vmatpush.msra.mxu0 %v1058_v12  ;;  %v1965_v9 = vld [vmem:[%s2315_s1 + $0x24] sm:$0x7]  ;;  %p1531_p13 = scmp.ne.s32.totalorder %s1529_s13, %s1530_s14  ;;  %p1536_p3 = scmp.lt.s32.totalorder %s1534_s23, %s1530_s14 }
  0x45   : > { %1401 = vmatpush.msra.mxu2 %v1057_v14  ;;  %1402 = vmatpush.msra.mxu3 %v1057_v14 }
  0x46   : > { %1397 = vmatpush.msra.mxu1 %v1058_v12  ;;  %1146 = vmatpush.msra.mxu0 %v1057_v14  ;;  %v536_v12 = vperm.slane %v1965_v9, 0  ;;  %p1532_p0 = pnand %p1531_p13, %p1647_p6  ;;  %p1537_p4 = por %p1536_p3, %p1535_p2 }
  0x47   : > { %1404 = vmatpush.msra.mxu2 %v1056_v18  ;;  %1405 = vmatpush.msra.mxu3 %v1056_v18 }
  0x48   : > { %1147 = vmatpush.msra.mxu0 %v1056_v18  ;;  %1400 = vmatpush.msra.mxu1 %v1057_v14  ;;  %v1503_v14 = vld [vmem:[%s2316_s2 + $0x9] ss:$0 sm:$0xff]  ;;  %p1533_p1 = pneg %p1532_p0 }
  0x49   : > { %444 = vperm.xlu2 %1467, %v1752_v32   ;;  %1407 = vmatpush.msra.mxu2 %v1055_v23 }
  0x4a   : > { %439 = vperm.xlu1 %1466, %v1755_v33   ;;  %434 = vperm.xlu0 %1465, %v1758_v34   ;;  %p1538_p5 = pnand %p1537_p4, %p1533_p1 }
  0x4b   : > { %1408 = vmatpush.msra.mxu3 %v1055_v23  ;;  %1410 = vmatpush.msra.mxu2 %v1054_v25 }
  0x4c   : > { %1148 = vmatpush.msra.mxu0 %v1055_v23  ;;  %1403 = vmatpush.msra.mxu1 %v1056_v18  ;;  %v786_v18 = vperm.slane %v1965_v9, 1 }
  0x4d   : > { %1411 = vmatpush.msra.mxu3 %v1054_v25 }
  0x4e   : > { %1149 = vmatpush.msra.mxu0 %v1054_v25  ;;  %1406 = vmatpush.msra.mxu1 %v1055_v23 }
  0x50   : > { %1409 = vmatpush.msra.mxu1 %v1054_v25 }
  0x51   : > { %459 = vperm.xlu2 %1467, %v1764_v35  }
  0x52   : > { %454 = vperm.xlu1 %1466, %v1767_v36   ;;  %449 = vperm.xlu0 %1465, %v1770_v37  }
  0x59   : > { %474 = vperm.xlu2 %1467, %v1776_v38  }
  0x5a   : > { %469 = vperm.xlu1 %1466, %v340_v39   ;;  %464 = vperm.xlu0 %1465, %v339_v40  }
  0x61   : > { %489 = vperm.xlu2 %1467, %v1782_v41  }
  0x62   : > { %484 = vperm.xlu1 %1466, %v1785_v42   ;;  %479 = vperm.xlu0 %1465, %v1788_v43  }
  0x69   : > { %504 = vperm.xlu2 %1467, %v347_v44  }
  0x6a   : > { %499 = vperm.xlu1 %1466, %v346_v45   ;;  %494 = vperm.xlu0 %1465, %v1796_v46  }
  0x71   : > { %519 = vperm.xlu2 %1467, %v1800_v47  }
  0x72   : > { %514 = vperm.xlu1 %1466, %v1803_v48   ;;  %509 = vperm.xlu0 %1465, %v1806_v49  }
  0x79   : > { %1469 = vset.pattern.permute.xlu2 %v1579_v51 }
  0x7a   : > { %1468 = vset.pattern.permute.xlu1 %v1579_v51  ;;  %524 = vperm.xlu0 %1465, %v1812_v50  }
  0x7b   : > { %682 = vperm.xlu2 %1469, %v1746_v31   ;;  %678 = vperm.xlu1 %1468, %v1734_v28  }
  0x82   : > { %1470 = vset.pattern.permute.xlu0 %v1580_v52 }
  0x83   : > { %694 = vperm.xlu2 %1469, %v1728_v26   ;;  %690 = vperm.xlu1 %1468, %v1743_v30  }
  0x84   : > { %901 = vperm.xlu0 %1470, %v339_v40  }
  0x8b   : > { %702 = vperm.xlu2 %1469, %v1758_v34   ;;  %698 = vperm.xlu1 %1468, %v1740_v29  }
  0x8c   : > { %1471 = vset.pattern.permute.xlu0 %v1579_v51 }
  0x8d   : > { %686 = vperm.xlu0 %1471, %v1731_v27  }
  0x93   : > { %714 = vperm.xlu2 %1469, %v1770_v37   ;;  %710 = vperm.xlu1 %1468, %v1752_v32   ;;  %v1828_v53 = vpop.permute.xlu2 %424 }
  0x95   : > { %706 = vperm.xlu0 %1471, %v1755_v33  }
  0x9b   : > { %726 = vperm.xlu2 %1469, %v339_v40   ;;  %722 = vperm.xlu1 %1468, %v1764_v35   ;;  %v1832_v54 = vpop.permute.xlu2 %429 }
  0x9d   : > { %718 = vperm.xlu0 %1471, %v1767_v36  }
  0xa3   : > { %754 = vperm.xlu2 %1469, %v346_v45   ;;  %730 = vperm.xlu1 %1468, %v340_v39   ;;  %v1835_v55 = vpop.permute.xlu2 %444 }
  0xa5   : > { %734 = vperm.xlu0 %1471, %v1776_v38  }
  0xab   : > { %1473 = vset.pattern.permute.xlu2 %v1580_v52  ;;  %1472 = vset.pattern.permute.xlu1 %v1580_v52  ;;  %v1840_v56 = vpop.permute.xlu2 %459 }
  0xac   : > { %v1842_v57 = vpop.permute.xlu1 %414  ;;  %929 = vperm.xlu2 %1473, %v346_v45   ;;  %905 = vperm.xlu1 %1472, %v340_v39   ;;  %v1845_v58 = vpop.permute.xlu0 %404 }
  0xad   : > { %766 = vperm.xlu0 %1471, %v1803_v48  }
  0xb3   : > { %v1847_v59 = vpop.permute.xlu2 %474 }
  0xb4   : > { %v1849_v60 = vpop.permute.xlu1 %419  ;;  %853 = vperm.xlu2 %1473, %v1734_v28   ;;  %1474 = vset.pattern.permute.xlu1 %v1579_v51  ;;  %v410_v61 = vpop.permute.xlu0 %409  ;;  %v556_v28 = vmul.f32 %v531_v21, %v1828_v53  ;;  %v1500_v53 = vld [vmem:[%s2316_s2 + $0x6] ss:$0 sm:$0xff]  ;;  %v1987_v21 = vld [vmem:[%s2315_s1 + $0xc] sm:$0x7] }
  0xb5   : > { %746 = vperm.xlu0 %1471, %v1782_v41   ;;  %758 = vperm.xlu1 %1474, %v347_v44   ;;  %v553_v11 = vmul.f32 %v528_v5, %v410_v61 }
  0xb7   : > { %v653_v16 = vadd.f32 %v1497_v10, %v553_v11 }
  0xbb   : > { %v1854_v62 = vpop.permute.xlu2 %489 }
  0xbc   : > { %v1856_v63 = vpop.permute.xlu1 %439  ;;  %909 = vperm.xlu2 %1473, %v1776_v38   ;;  %v1860_v0 = vpop.permute.xlu0 %434  ;;  %v1052_v38 = vld [vmem:[%s2317_s3] sm:$0xff] }
  0xbd   : > { %1482 = vset.pattern.permute.xlu0 %v1580_v52  ;;  %1475 = vset.pattern.permute.xlu1 %v1580_v52 }
  0xbe   : > { %933 = vperm.xlu0 %1482, %v347_v44   ;;  %877 = vperm.xlu1 %1475, %v1758_v34   ;;  %v1053_v34 = vld [vmem:[%s2317_s3 + $0x8] sm:$0xff] }
  0xbf   : > { %1413 = vmatpush.msra.mxu2 %v1053_v34  ;;  %1414 = vmatpush.msra.mxu3 %v1053_v34 }
  0xc0   : > { %1150 = vmatpush.msra.mxu0 %v1053_v34  ;;  %1412 = vmatpush.msra.mxu1 %v1053_v34 }
  0xc1   : > { %1416 = vmatpush.msra.mxu2 %v1052_v38  ;;  %1417 = vmatpush.msra.mxu3 %v1052_v38 }
  0xc2   : > { %1151 = vmatpush.msra.mxu0 %v1052_v38  ;;  %1415 = vmatpush.msra.mxu1 %v1052_v38 }
  0xc3   : > { %v1864_v1 = vpop.permute.xlu2 %504 }
  0xc4   : > { %v1866_v2 = vpop.permute.xlu1 %454  ;;  %1477 = vset.pattern.permute.xlu2 %v1579_v51  ;;  %v1869_v3 = vpop.permute.xlu0 %449 }
  0xc5   : > { %762 = vperm.xlu2 %1477, %v1806_v49  }
  0xc6   : > { %913 = vperm.xlu0 %1482, %v1788_v43   ;;  %1476 = vset.pattern.permute.xlu1 %v1579_v51 }
  0xc7   : > { %738 = vperm.xlu1 %1476, %v1788_v43  }
  0xcb   : > { %v1881_v6 = vpop.permute.xlu2 %519 }
  0xcc   : > { %v1883_v7 = vpop.permute.xlu1 %469  ;;  %v1885_v8 = vpop.permute.xlu0 %464 }
  0xcd   : > { %1479 = vset.pattern.permute.xlu2 %v1580_v52 }
  0xce   : > { %889 = vperm.xlu0 %1482, %v1770_v37   ;;  %881 = vperm.xlu2 %1479, %v1755_v33   ;;  %v1938_v33 = vld [vmem:[%s2315_s1 + $0x18] sm:$0x7] }
  0xcf   : > { %1478 = vset.pattern.permute.xlu1 %v1580_v52  ;;  %v533_v44 = vperm.slane %v1938_v33, 0  ;;  %v783_v5 = vperm.slane %v1938_v33, 1 }
  0xd0   : > { %857 = vperm.xlu1 %1478, %v1746_v31   ;;  %v781_v31 = vperm.slane %v1908_v15, 1 }
  0xd1   : > { %v558_v61 = vmul.f32 %v533_v44, %v1860_v0  ;;  %v780_v44 = vperm.slane %v1987_v21, 1 }
  0xd3   : > { %v658_v11 = vadd.f32 %v1500_v53, %v558_v61 }
  0xd4   : > { %v1910_v17 = vpop.permute.xlu1 %484  ;;  %v1915_v19 = vpop.permute.xlu0 %479 }
  0xd5   : > { %v683_v20 = vpop.permute.xlu2 %682 }
  0xd6   : > { %v803_v22 = vmul.f32 %v778_v13, %v683_v20  ;;  %869 = vperm.xlu0 %1482, %v1728_v26   ;;  %1480 = vset.pattern.permute.xlu2 %v1579_v51  ;;  %v1489_v26 = vld [vmem:[%s2316_s2 + $0x4] ss:$0 sm:$0xff]  ;;  %v364_v20 = vld [vmem:[%s2315_s1 + $0x30] sm:$0x7] }
  0xd7   : > { %742 = vperm.xlu2 %1480, %v1785_v42   ;;  %v656_v43 = vadd.f32 %v1489_v26, %v556_v28  ;;  %v789_v38 = vperm.slane %v364_v20, 1 }
  0xd8   : > { %v1924_v24 = vadd.f32 %v803_v22, %v653_v16  ;;  %937 = vperm.xlu1 %1478, %v1806_v49   ;;  %v561_v16 = vmul.f32 %v536_v12, %v1869_v3  ;;  %v530_v3 = vperm.slane %v1987_v21, 0 }
  0xda   : > { %v661_v22 = vadd.f32 %v1503_v14, %v561_v16 }
  0xdc   : > { %v1943_v37 = vpop.permute.xlu1 %499  ;;  %v1948_v39 = vpop.permute.xlu0 %494 }
  0xdd   : > { %v695_v40 = vpop.permute.xlu2 %694 }
  0xde   : > { %v806_v45 = vmul.f32 %v781_v31, %v695_v40  ;;  %949 = vperm.xlu0 %1482, %v1812_v50   ;;  %v1506_v31 = vld [vmem:[%s2316_s2 + $0xc] ss:$0 sm:$0xff]  ;;  %v1496_v40 = vld [vmem:[%s2316_s2 + $0x3] ss:$0 sm:$0xff] }
  0xdf   : > { %1481 = vset.pattern.permute.xlu2 %v1580_v52 }
  0xe0   : > { %v1953_v49 = vadd.f32 %v806_v45, %v656_v43  ;;  %885 = vperm.xlu2 %1481, %v1752_v32   ;;  %861 = vperm.xlu1 %1478, %v1731_v27   ;;  %v555_v43 = vmul.f32 %v530_v3, %v1849_v60  ;;  %v2011_v45 = vld [vmem:[%s2315_s1 + $0x14] sm:$0x7] }
  0xe1   : > { %v532_v60 = vperm.slane %v2011_v45, 0  ;;  %v782_v3 = vperm.slane %v2011_v45, 1 }
  0xe2   : > { %v655_v12 = vadd.f32 %v1496_v40, %v555_v43 }
  0xe4   : > { %v1967_v32 = vpop.permute.xlu1 %514  ;;  %v1969_v27 = vpop.permute.xlu0 %509 }
  0xe5   : > { %v703_v10 = vpop.permute.xlu2 %702 }
  0xe6   : > { %v808_v0 = vmul.f32 %v783_v5, %v703_v10 }
  0xe8   : > { %v1972_v13 = vadd.f32 %v808_v0, %v658_v11  ;;  %941 = vperm.xlu2 %1481, %v1803_v48   ;;  %917 = vperm.xlu1 %1478, %v1785_v42   ;;  %v539_v42 = vperm.slane %v364_v20, 0 }
  0xea   : > { %v564_v34 = vmul.f32 %v539_v42, %v1885_v8  ;;  %v2016_v8 = vld [vmem:[%s2315_s1 + $0x8] sm:$0x7]  ;;  %v1490_v42 = vld [vmem:[%s2316_s2 + $0x5] ss:$0 sm:$0xff] }
  0xeb   : > { %v529_v16 = vperm.slane %v2016_v8, 0 }
  0xec   : > { %v1989_v23 = vpop.permute.xlu0 %524  ;;  %v664_v61 = vadd.f32 %v1506_v31, %v564_v34 }
  0xed   : > { %v715_v48 = vpop.permute.xlu2 %714  ;;  %v1991_v26 = vpop.permute.xlu1 %678  ;;  %v554_v31 = vmul.f32 %v529_v16, %v1842_v57  ;;  %v1509_v57 = vld [vmem:[%s2316_s2 + $0x13] ss:$0 sm:$0xff] }
  0xee   : > { %v811_v25 = vmul.f32 %v786_v18, %v715_v48  ;;  %v371_v48 = vld [vmem:[%s2315_s1 + $0x4c] sm:$0x7] }
  0xef   : > { %v546_v40 = vperm.slane %v371_v48, 0  ;;  %v971_v16 = vperm.slane %v371_v48, 2 }
  0xf0   : > { %v1994_v28 = vadd.f32 %v811_v25, %v661_v22  ;;  %865 = vperm.xlu2 %1481, %v1743_v30   ;;  %1483 = vset.pattern.permute.xlu1 %v1579_v51  ;;  %v964_v30 = vperm.slane %v364_v20, 2  ;;  %v557_v25 = vmul.f32 %v532_v60, %v1832_v54  ;;  %v352_v60 = vld [vmem:[%s2315_s1] sm:$0x7] }
  0xf1   : > { %770 = vperm.xlu1 %1483, %v1800_v47  }
  0xf2   : > { %v657_v54 = vadd.f32 %v1490_v42, %v557_v25 }
  0xf5   : > { %v727_v53 = vpop.permute.xlu2 %726  ;;  %v691_v10 = vpop.permute.xlu1 %690 }
  0xf6   : > { %v814_v5 = vmul.f32 %v789_v38, %v727_v53  ;;  %v902_v11 = vpop.permute.xlu0 %901  ;;  %v805_v0 = vmul.f32 %v780_v44, %v691_v10  ;;  %v779_v38 = vperm.slane %v2016_v8, 1  ;;  %v571_v10 = vmul.f32 %v546_v40, %v1943_v37 }
  0xf7   : > { %v989_v14 = vmul.f32 %v964_v30, %v902_v11  ;;  %v796_v30 = vperm.slane %v371_v48, 1  ;;  %v527_v37 = vperm.slane %v352_v60, 0  ;;  %v1494_v48 = vld [vmem:[%s2316_s2] ss:$0 sm:$0xff] }
  0xf8   : > { %v839_v18 = vadd.f32 %v814_v5, %v664_v61  ;;  %945 = vperm.xlu2 %1481, %v1800_v47   ;;  %v2021_v20 = vadd.f32 %v805_v0, %v655_v12  ;;  %v1493_v47 = vld [vmem:[%s2316_s2 + $0x2] ss:$0 sm:$0xff]  ;;  %v2055_v0 = vld [vmem:[%s2315_s1 + $0x2c] sm:$0x7] }
  0xf9   : > { %1484 = vset.pattern.permute.xlu1 %v1580_v52  ;;  %v654_v61 = vadd.f32 %v1493_v47, %v554_v31 }
  0xfa   : > { %v1014_v22 = vadd.f32 %v989_v14, %v839_v18  ;;  %921 = vperm.xlu1 %1484, %v1782_v41   ;;  %v671_v18 = vadd.f32 %v1509_v57, %v571_v10 }
  0xfc   : > { %v1039_v34 = vmax.f32 %v1014_v22, 0.0  ;;  %v538_v22 = vperm.slane %v2055_v0, 0 }
  0xfd   : > { %v755_v43 = vpop.permute.xlu2 %754  ;;  %v699_v44 = vpop.permute.xlu1 %698 }
  0xfe   : > { %1378 = vmatmul.msk.f32.vlgmr.msra.gmra.mxu2 %vm1060_vm0, %v1039_v34  ;;  %v807_v41 = vmul.f32 %v782_v3, %v699_v44  ;;  %v821_v14 = vmul.f32 %v796_v30, %v755_v43  ;;  %v777_v3 = vperm.slane %v352_v60, 1  ;;  %v563_v43 = vmul.f32 %v538_v22, %v1840_v56  ;;  %v1492_v44 = vld [vmem:[%s2316_s2 + $0xb] ss:$0 sm:$0xff] }
  0xff   : > { %v687_v53 = vpop.permute.xlu0 %686 }
 0x100   : > { %v804_v5 = vmul.f32 %v779_v38, %v687_v53  ;;  %1486 = vset.pattern.permute.xlu2 %v1579_v51  ;;  %v2044_v11 = vadd.f32 %v807_v41, %v657_v54  ;;  %v846_v47 = vadd.f32 %v821_v14, %v671_v18  ;;  %v552_v38 = vmul.f32 %v527_v37, %v1845_v58  ;;  %v1502_v58 = vld [vmem:[%s2316_s2 + $0xa] ss:$0 sm:$0xff] }
 0x101   : > { %774 = vperm.xlu2 %1486, %v1812_v50   ;;  %v2062_v50 = vld [vmem:[%s2315_s1 + $0x28] sm:$0x7]  ;;  %v802_v54 = vmul.f32 %v777_v3, %v1991_v26  ;;  %v788_v41 = vperm.slane %v2055_v0, 1  ;;  %v952_v53 = vperm.slane %v352_v60, 2  ;;  %v663_v57 = vadd.f32 %v1492_v44, %v563_v43 }
 0x102   : > { %v2050_v12 = vadd.f32 %v804_v5, %v654_v61  ;;  %1485 = vset.pattern.permute.xlu1 %v1579_v51  ;;  %v537_v51 = vperm.slane %v2062_v50, 0  ;;  %v652_v56 = vadd.f32 %v1494_v48, %v552_v38 }
 0x103   : > { %750 = vperm.xlu1 %1485, %v1796_v46  }
 0x104   : > { %v562_v61 = vmul.f32 %v537_v51, %v1866_v2  ;;  %v827_v10 = vadd.f32 %v802_v54, %v652_v56  ;;  %v366_v51 = vld [vmem:[%s2315_s1 + $0x38] sm:$0x7] }
 0x105   : > { %v2065_v42 = vpop.permute.xlu1 %710  ;;  %v791_v54 = vperm.slane %v366_v51, 1 }
 0x106   : > { %v930_v25 = vpop.permute.xlu2 %929  ;;  %v662_v37 = vadd.f32 %v1502_v58, %v562_v61 }
 0x107   : > { %v996_v31 = vmul.f32 %v971_v16, %v930_v25  ;;  %v2067_v34 = vpop.permute.xlu0 %706 }
 0x109   : > { %v1021_v40 = vadd.f32 %v996_v31, %v846_v47  ;;  %1488 = vset.pattern.permute.xlu2 %v1580_v52 }
 0x10a   : > { %925 = vperm.xlu2 %1488, %v1796_v46   ;;  %v787_v46 = vperm.slane %v2062_v50, 1 }
 0x10b   : > { %v1046_v30 = vmax.f32 %v1021_v40, 0.0  ;;  %1487 = vset.pattern.permute.xlu1 %v1580_v52  ;;  %v541_v40 = vperm.slane %v366_v51, 0 }
 0x10c   : > { %893 = vperm.xlu1 %1487, %v1767_v36   ;;  %v365_v36 = vld [vmem:[%s2315_s1 + $0x34] sm:$0x7] }
 0x10d   : > { %1385 = vmatmul.msk.f32.vlgmr.msra.gmra.mxu3 %vm1060_vm0, %v1046_v30  ;;  %v723_v26 = vpop.permute.xlu1 %722  ;;  %v540_v3 = vperm.slane %v365_v36, 0  ;;  %v790_v38 = vperm.slane %v365_v36, 1  ;;  %v965_v30 = vperm.slane %v365_v36, 2 }
 0x10e   : > { %v854_v5 = vpop.permute.xlu2 %853  ;;  %v813_v60 = vmul.f32 %v788_v41, %v723_v26  ;;  %v1495_v41 = vld [vmem:[%s2316_s2 + $0xe] ss:$0 sm:$0xff] }
 0x10f   : > { %v977_v14 = vmul.f32 %v952_v53, %v854_v5  ;;  %v719_v16 = vpop.permute.xlu0 %718  ;;  %v565_v43 = vmul.f32 %v540_v3, %v1883_v7  ;;  %v566_v53 = vmul.f32 %v541_v40, %v1847_v59  ;;  %v966_v5 = vperm.slane %v366_v51, 2  ;;  %v1498_v59 = vld [vmem:[%s2316_s2 + $0x11] ss:$0 sm:$0xff] }
 0x110   : > { %v812_v18 = vmul.f32 %v787_v46, %v719_v16  ;;  %v2090_v22 = vadd.f32 %v813_v60, %v663_v57 }
 0x111   : > { %v1002_v2 = vadd.f32 %v977_v14, %v827_v10  ;;  %v666_v60 = vadd.f32 %v1495_v41, %v566_v53 }
 0x112   : > { %v2092_v52 = vadd.f32 %v812_v18, %v662_v37  ;;  %897 = vperm.xlu2 %1488, %v1764_v35   ;;  %v1505_v35 = vld [vmem:[%s2316_s2 + $0xd] ss:$0 sm:$0xff]  ;;  %v372_v37 = vld [vmem:[%s2315_s1 + $0x50] sm:$0x7] }
 0x113   : > { %v1027_v25 = vmax.f32 %v1002_v2, 0.0  ;;  %v665_v58 = vadd.f32 %v1505_v35, %v565_v43  ;;  %v547_v3 = vperm.slane %v372_v37, 0  ;;  %v797_v35 = vperm.slane %v372_v37, 1 }
 0x114   : > { %873 = vperm.xlu1 %1487, %v1740_v29   ;;  %v2110_v29 = vld [vmem:[%s2315_s1 + $0x44] sm:$0x7]  ;;  %v972_v53 = vperm.slane %v372_v37, 2 }
 0x115   : > { %1366 = vmatmul.msk.f32.vlgmr.msra.gmra.mxu0 %vm1060_vm0, %v1027_v25  ;;  %v731_v47 = vpop.permute.xlu1 %730  ;;  %v544_v61 = vperm.slane %v2110_v29, 0  ;;  %v794_v25 = vperm.slane %v2110_v29, 1 }
 0x116   : > { %v910_v31 = vpop.permute.xlu2 %909  ;;  %v815_v44 = vmul.f32 %v790_v38, %v731_v47 }
 0x117   : > { %v735_v48 = vpop.permute.xlu0 %734  ;;  %v569_v16 = vmul.f32 %v544_v61, %v1854_v62  ;;  %v991_v2 = vmul.f32 %v966_v5, %v910_v31  ;;  %v1501_v31 = vld [vmem:[%s2316_s2 + $0x14] ss:$0 sm:$0xff]  ;;  %v958_v61 = vperm.slane %v1938_v33, 2 }
 0x118   : > { %v840_v7 = vadd.f32 %v815_v44, %v665_v58  ;;  %v816_v26 = vmul.f32 %v791_v54, %v735_v48  ;;  %v359_v44 = vld [vmem:[%s2315_s1 + $0x1c] sm:$0x7]  ;;  %v572_v54 = vmul.f32 %v547_v3, %v1864_v1  ;;  %v1499_v1 = vld [vmem:[%s2316_s2 + $0x7] ss:$0 sm:$0xff] }
 0x119   : > { %v669_v51 = vadd.f32 %v1498_v59, %v569_v16  ;;  %v534_v58 = vperm.slane %v359_v44, 0  ;;  %v959_v37 = vperm.slane %v359_v44, 2 }
 0x11a   : > { %v841_v18 = vadd.f32 %v816_v26, %v666_v60  ;;  %v784_v26 = vperm.slane %v359_v44, 1 }
 0x11b   : > { %v559_v59 = vmul.f32 %v534_v58, %v1856_v63  ;;  %v1508_v63 = vld [vmem:[%s2316_s2 + $0xf] ss:$0 sm:$0xff] }
 0x11c   : > { %v1016_v48 = vadd.f32 %v991_v2, %v841_v18  ;;  %v360_v18 = vld [vmem:[%s2315_s1 + $0x20] sm:$0x7] }
 0x11d   : > { %v960_v58 = vperm.slane %v360_v18, 2 }
 0x11e   : > { %v906_v46 = vpop.permute.xlu1 %905 }
 0x11f   : > { %v2117_v56 = vpop.permute.xlu0 %766  ;;  %v990_v57 = vmul.f32 %v965_v30, %v906_v46  ;;  %v2119_v10 = vpop.permute.xlu2 %762  ;;  %v1041_v30 = vmax.f32 %v1016_v48, 0.0  ;;  %v672_v46 = vadd.f32 %v1501_v31, %v572_v54  ;;  %v659_v48 = vadd.f32 %v1499_v1, %v559_v59  ;;  %v373_v1 = vld [vmem:[%s2315_s1 + $0x54] sm:$0x7] }
 0x120   : > { %v785_v54 = vperm.slane %v360_v18, 1 }
 0x121   : > { %v1015_v14 = vadd.f32 %v990_v57, %v840_v7  ;;  %v367_v7 = vld [vmem:[%s2315_s1 + $0x3c] sm:$0x7] }
 0x122   : > { %v542_v2 = vperm.slane %v367_v7, 0  ;;  %v967_v44 = vperm.slane %v367_v7, 2  ;;  %v792_v31 = vperm.slane %v367_v7, 1  ;;  %v810_v7 = vmul.f32 %v785_v54, %v2065_v42 }
 0x123   : > { %v1040_v36 = vmax.f32 %v1015_v14, 0.0  ;;  %v973_v54 = vperm.slane %v373_v1, 2 }
 0x125   : > { %1379 = vmatmul.msk.f32.gmra.mxu2 %vm1060_vm0, %v1040_v36 }
 0x127   : > { %v747_v47 = vpop.permute.xlu0 %746  ;;  %v759_v38 = vpop.permute.xlu1 %758 }
 0x128   : > { %v819_v62 = vmul.f32 %v794_v25, %v747_v47  ;;  %v882_v40 = vpop.permute.xlu2 %881  ;;  %v822_v41 = vmul.f32 %v797_v35, %v759_v38  ;;  %v809_v25 = vmul.f32 %v784_v26, %v2067_v34  ;;  %v567_v35 = vmul.f32 %v542_v2, %v1915_v19  ;;  %v1491_v34 = vld [vmem:[%s2316_s2 + $0x8] ss:$0 sm:$0xff] }
 0x12a   : > { %v2130_v43 = vadd.f32 %v819_v62, %v669_v51  ;;  %v847_v57 = vadd.f32 %v822_v41, %v672_v46  ;;  %v535_v51 = vperm.slane %v360_v18, 0  ;;  %v984_v62 = vmul.f32 %v959_v37, %v882_v40 }
 0x12b   : > { %v548_v18 = vperm.slane %v373_v1, 0 }
 0x12c   : > { %v560_v40 = vmul.f32 %v535_v51, %v1835_v55  ;;  %v953_v55 = vperm.slane %v1878_v4, 2  ;;  %v374_v51 = vld [vmem:[%s2315_s1 + $0x58] sm:$0x7] }
 0x12d   : > { %1380 = vmatmul.msk.f32.gmra.mxu2 %vm1060_vm0, %v1041_v30  ;;  %v834_v30 = vadd.f32 %v809_v25, %v659_v48  ;;  %v1512_v48 = vld [vmem:[%s2316_s2 + $0x15] ss:$0 sm:$0xff]  ;;  %v573_v4 = vmul.f32 %v548_v18, %v1969_v27  ;;  %v1511_v27 = vld [vmem:[%s2316_s2 + $0x16] ss:$0 sm:$0xff] }
 0x12f   : > { %v1009_v41 = vadd.f32 %v984_v62, %v834_v30  ;;  %v673_v30 = vadd.f32 %v1512_v48, %v573_v4 }
 0x130   : > { %v934_v5 = vpop.permute.xlu0 %933  ;;  %v878_v14 = vpop.permute.xlu1 %877 }
 0x131   : > { %v997_v60 = vmul.f32 %v972_v53, %v934_v5  ;;  %v2144_v16 = vpop.permute.xlu2 %742  ;;  %v983_v33 = vmul.f32 %v958_v61, %v878_v14  ;;  %v667_v61 = vadd.f32 %v1508_v63, %v567_v35  ;;  %v549_v35 = vperm.slane %v374_v51, 0 }
 0x133   : > { %v1022_v36 = vadd.f32 %v997_v60, %v847_v57  ;;  %v1008_v3 = vadd.f32 %v983_v33, %v1972_v13  ;;  %v660_v57 = vadd.f32 %v1491_v34, %v560_v40  ;;  %v1034_v60 = vmax.f32 %v1009_v41, 0.0 }
 0x135   : > { %v1047_v47 = vmax.f32 %v1022_v36, 0.0  ;;  %v1033_v38 = vmax.f32 %v1008_v3, 0.0  ;;  %v835_v37 = vadd.f32 %v810_v7, %v660_v57  ;;  %v961_v36 = vperm.slane %v1965_v9, 2 }
 0x136   : > { %v798_v3 = vperm.slane %v373_v1, 1  ;;  %v954_v57 = vperm.slane %v2016_v8, 2 }
 0x137   : > { %1386 = vmatmul.msk.f32.gmra.mxu3 %vm1060_vm0, %v1047_v47  ;;  %1372 = vmatmul.msk.f32.vlgmr.msra.gmra.mxu1 %vm1060_vm0, %v1033_v38 }
 0x138   : > { %v914_v13 = vpop.permute.xlu0 %913 }
 0x139   : > { %v739_v53 = vpop.permute.xlu1 %738  ;;  %v992_v19 = vmul.f32 %v967_v44, %v914_v13  ;;  %v823_v44 = vmul.f32 %v798_v3, %v2119_v10  ;;  %v799_v13 = vperm.slane %v374_v51, 1  ;;  %v375_v3 = vld [vmem:[%s2315_s1 + $0x5c] sm:$0x7] }
 0x13a   : > { %v817_v46 = vmul.f32 %v792_v31, %v739_v53  ;;  %v886_v26 = vpop.permute.xlu2 %885  ;;  %v974_v53 = vperm.slane %v374_v51, 2  ;;  %v550_v4 = vperm.slane %v375_v3, 0 }
 0x13b   : > { %v985_v14 = vmul.f32 %v960_v58, %v886_v26  ;;  %v848_v41 = vadd.f32 %v823_v44, %v673_v30  ;;  %v824_v58 = vmul.f32 %v799_v13, %v2117_v56  ;;  %v800_v30 = vperm.slane %v375_v3, 1 }
 0x13c   : > { %v842_v5 = vadd.f32 %v817_v46, %v667_v61 }
 0x13d   : > { %v1010_v2 = vadd.f32 %v985_v14, %v835_v37 }
 0x13e   : > { %v1017_v59 = vadd.f32 %v992_v19, %v842_v5 }
 0x13f   : > { %1373 = vmatmul.msk.f32.gmra.mxu1 %vm1060_vm0, %v1034_v60  ;;  %v1035_v62 = vmax.f32 %v1010_v2, 0.0 }
 0x140   : > { %v1042_v33 = vmax.f32 %v1017_v59, 0.0  ;;  %v890_v42 = vpop.permute.xlu0 %889  ;;  %v955_v59 = vperm.slane %v1987_v21, 2 }
 0x141   : > { %v986_v38 = vmul.f32 %v961_v36, %v890_v42 }
 0x142   : > { %v858_v25 = vpop.permute.xlu1 %857  ;;  %1381 = vmatmul.msk.f32.gmra.mxu2 %vm1060_vm0, %v1042_v33  ;;  %v942_v63 = vpop.permute.xlu2 %941 }
 0x143   : > { %v978_v47 = vmul.f32 %v953_v55, %v858_v25  ;;  %v1011_v34 = vadd.f32 %v986_v38, %v1994_v28  ;;  %v368_v28 = vld [vmem:[%s2315_s1 + $0x40] sm:$0x7]  ;;  %v999_v26 = vmul.f32 %v974_v53, %v942_v63  ;;  %v1507_v55 = vld [vmem:[%s2316_s2 + $0x10] ss:$0 sm:$0xff] }
 0x144   : > { %v793_v14 = vperm.slane %v368_v28, 1  ;;  %v968_v25 = vperm.slane %v368_v28, 2  ;;  %v376_v38 = vld [vmem:[%s2315_s1 + $0x60] sm:$0x7] }
 0x145   : > { %v1003_v9 = vadd.f32 %v978_v47, %v1924_v24  ;;  %v574_v24 = vmul.f32 %v549_v35, %v1967_v32  ;;  %v1036_v61 = vmax.f32 %v1011_v34, 0.0  ;;  %v543_v32 = vperm.slane %v368_v28, 0 }
 0x146   : > { %v818_v8 = vmul.f32 %v793_v14, %v2144_v16  ;;  %v801_v13 = vperm.slane %v376_v38, 1 }
 0x147   : > { %v1028_v31 = vmax.f32 %v1003_v9, 0.0  ;;  %1374 = vmatmul.msk.f32.gmra.mxu1 %vm1060_vm0, %v1035_v62  ;;  %v674_v46 = vadd.f32 %v1511_v27, %v574_v24  ;;  %v568_v33 = vmul.f32 %v543_v32, %v1910_v17 }
 0x148   : > { %v870_v62 = vpop.permute.xlu0 %869 }
 0x149   : > { %1367 = vmatmul.msk.f32.gmra.mxu0 %vm1060_vm0, %v1028_v31  ;;  %v849_v60 = vadd.f32 %v824_v58, %v674_v46  ;;  %v668_v21 = vadd.f32 %v1507_v55, %v568_v33  ;;  %v1504_v31 = vld [vmem:[%s2316_s2 + $0x17] ss:$0 sm:$0xff] }
 0x14a   : > { %v938_v40 = vpop.permute.xlu1 %937  ;;  %v866_v7 = vpop.permute.xlu2 %865 }
 0x14b   : > { %v998_v10 = vmul.f32 %v973_v54, %v938_v40  ;;  %v1024_v1 = vadd.f32 %v999_v26, %v849_v60  ;;  %v980_v36 = vmul.f32 %v955_v59, %v866_v7  ;;  %v843_v17 = vadd.f32 %v818_v8, %v668_v21 }
 0x14c   : > { %v575_v54 = vmul.f32 %v550_v4, %v1881_v6 }
 0x14d   : > { %v1023_v19 = vadd.f32 %v998_v10, %v848_v41  ;;  %v1049_v2 = vmax.f32 %v1024_v1, 0.0  ;;  %v1005_v16 = vadd.f32 %v980_v36, %v2021_v20  ;;  %v975_v20 = vperm.slane %v375_v3, 2  ;;  %v1513_v41 = vld [vmem:[%s2316_s2 + $0x18] ss:$0 sm:$0xff] }
 0x14e   : > { %v675_v24 = vadd.f32 %v1504_v31, %v575_v54 }
 0x14f   : > { %v1048_v5 = vmax.f32 %v1023_v19, 0.0  ;;  %1375 = vmatmul.msk.f32.gmra.mxu1 %vm1060_vm0, %v1036_v61  ;;  %v1030_v35 = vmax.f32 %v1005_v16, 0.0  ;;  %v976_v61 = vperm.slane %v376_v38, 2 }
 0x150   : > { %v950_v46 = vpop.permute.xlu0 %949 }
 0x151   : > { %1387 = vmatmul.msk.f32.gmra.mxu3 %vm1060_vm0, %v1048_v5 }
 0x152   : > { %v862_v56 = vpop.permute.xlu1 %861  ;;  %v946_v47 = vpop.permute.xlu2 %945 }
 0x153   : > { %v979_v37 = vmul.f32 %v954_v57, %v862_v56  ;;  %v1000_v10 = vmul.f32 %v975_v20, %v946_v47  ;;  %v1001_v57 = vmul.f32 %v976_v61, %v950_v46  ;;  %v962_v47 = vperm.slane %v2062_v50, 2 }
 0x154   : > { %v957_v50 = vperm.slane %v2011_v45, 2 }
 0x155   : > { %v1004_v18 = vadd.f32 %v979_v37, %v2050_v12  ;;  %v956_v12 = vperm.slane %v1908_v15, 2  ;;  %v551_v15 = vperm.slane %v376_v38, 0 }
 0x157   : > { %v1029_v42 = vmax.f32 %v1004_v18, 0.0  ;;  %v981_v9 = vmul.f32 %v956_v12, %v870_v62  ;;  %v576_v53 = vmul.f32 %v551_v15, %v1989_v23  ;;  %v370_v23 = vld [vmem:[%s2315_s1 + $0x48] sm:$0x7] }
 0x158   : > { %v545_v56 = vperm.slane %v370_v23, 0  ;;  %v970_v18 = vperm.slane %v370_v23, 2  ;;  %v795_v8 = vperm.slane %v370_v23, 1 }
 0x159   : > { %1368 = vmatmul.msk.f32.gmra.mxu0 %vm1060_vm0, %v1029_v42  ;;  %1388 = vmatmul.msk.f32.gmra.mxu3 %vm1060_vm0, %v1049_v2  ;;  %v1006_v34 = vadd.f32 %v981_v9, %v1953_v49  ;;  %v676_v26 = vadd.f32 %v1513_v41, %v576_v53  ;;  %v969_v49 = vperm.slane %v2110_v29, 2  ;;  %v1510_v29 = vld [vmem:[%s2316_s2 + $0x12] ss:$0 sm:$0xff] }
 0x15a   : > { %v918_v51 = vpop.permute.xlu1 %917  ;;  %v570_v55 = vmul.f32 %v545_v56, %v1948_v39  ;;  %v963_v39 = vperm.slane %v2055_v0, 2 }
 0x15b   : > { %v993_v48 = vmul.f32 %v968_v25, %v918_v51  ;;  %v775_v40 = vpop.permute.xlu2 %774  ;;  %v1031_v28 = vmax.f32 %v1006_v34, 0.0 }
 0x15c   : > { %v826_v58 = vmul.f32 %v801_v13, %v775_v40  ;;  %v670_v42 = vadd.f32 %v1510_v29, %v570_v55 }
 0x15d   : > { %v1018_v63 = vadd.f32 %v993_v48, %v843_v17 }
 0x15e   : > { %v851_v5 = vadd.f32 %v826_v58, %v676_v26 }
 0x15f   : > { %v1043_v44 = vmax.f32 %v1018_v63, 0.0 }
 0x160   : > { %v1026_v1 = vadd.f32 %v1001_v57, %v851_v5 }
 0x161   : > { %1369 = vmatmul.msk.f32.gmra.mxu0 %vm1060_vm0, %v1030_v35  ;;  %1382 = vmatmul.msk.f32.gmra.mxu2 %vm1060_vm0, %v1043_v44 }
 0x162   : > { %v1051_v33 = vmax.f32 %v1026_v1, 0.0 }
 0x163   : > { %v771_v27 = vpop.permute.xlu1 %770 }
 0x164   : > { %v825_v6 = vmul.f32 %v800_v30, %v771_v27  ;;  %v926_v2 = vpop.permute.xlu2 %925 }
 0x165   : > { %v995_v25 = vmul.f32 %v970_v18, %v926_v2 }
 0x166   : > { %v850_v19 = vadd.f32 %v825_v6, %v675_v24 }
 0x168   : > { %v1025_v7 = vadd.f32 %v1000_v10, %v850_v19 }
 0x169   : > { %1370 = vmatmul.msk.f32.gmra.mxu0 %vm1060_vm0, %v1031_v28 }
 0x16a   : > { %v1050_v32 = vmax.f32 %v1025_v7, 0.0 }
 0x16c   : > { %v922_v60 = vpop.permute.xlu1 %921  ;;  %1389 = vmatmul.msk.f32.gmra.mxu3 %vm1060_vm0, %v1050_v32  ;;  %v898_v16 = vpop.permute.xlu2 %897 }
 0x16d   : > { %v994_v14 = vmul.f32 %v969_v49, %v922_v60  ;;  %v988_v38 = vmul.f32 %v963_v39, %v898_v16 }
 0x16f   : > { %v1019_v59 = vadd.f32 %v994_v14, %v2130_v43  ;;  %v1013_v0 = vadd.f32 %v988_v38, %v2090_v22 }
 0x171   : > { %v1044_v37 = vmax.f32 %v1019_v59, 0.0  ;;  %v1038_v44 = vmax.f32 %v1013_v0, 0.0 }
 0x173   : > { %1383 = vmatmul.msk.f32.gmra.mxu2 %vm1060_vm0, %v1044_v37 }
 0x174   : > { %1390 = vmatmul.msk.f32.gmra.mxu3 %vm1060_vm0, %v1051_v33 }
 0x175   : > { %v751_v36 = vpop.permute.xlu1 %750 }
 0x176   : > { %v820_v43 = vmul.f32 %v795_v8, %v751_v36 }
 0x178   : > { %v845_v3 = vadd.f32 %v820_v43, %v670_v42 }
 0x17a   : > { %v1020_v21 = vadd.f32 %v995_v25, %v845_v3 }
 0x17c   : > { %v1045_v51 = vmax.f32 %v1020_v21, 0.0 }
 0x17e   : > { %v894_v17 = vpop.permute.xlu1 %893  ;;  %1384 = vmatmul.msk.f32.gmra.mxu2 %vm1060_vm0, %v1045_v51 }
 0x17f   : > { %v987_v12 = vmul.f32 %v962_v47, %v894_v17 }
 0x181   : > { %v1189_v48 = vpop.f32.mrf.mxu2  ;;  %v1012_v4 = vadd.f32 %v987_v12, %v2092_v52 }
 0x182   : > { %v1240_v62 = vmax.f32 %v1189_v48, 0.0 }
 0x183   : > { %v1037_v63 = vmax.f32 %v1012_v4, 0.0 }
 0x184   : > { %1265 = vst [vmem:[%s2242_s5 + $0x60] sm:$0xff] %v1240_v62 }
 0x185   : > { %1376 = vmatmul.msk.f32.gmra.mxu1 %vm1060_vm0, %v1037_v63 }
 0x186   : > { %v874_v9 = vpop.permute.xlu1 %873 }
 0x187   : > { %v982_v35 = vmul.f32 %v957_v50, %v874_v9 }
 0x189   : > { %v1007_v52 = vadd.f32 %v982_v35, %v2044_v11 }
 0x18b   : > { %v1032_v31 = vmax.f32 %v1007_v52, 0.0 }
 0x18d   : > { %1371 = vmatmul.msk.f32.gmra.mxu0 %vm1060_vm0, %v1032_v31  ;;  %1377 = vmatmul.msk.f32.gmra.mxu1 %vm1060_vm0, %v1038_v44 }
 0x190   : > { %v1210_v54 = vpop.f32.mrf.mxu3 }
 0x191   : > { %v1247_v15 = vmax.f32 %v1210_v54, 0.0 }
 0x192   : > { %v1153_v45 = vpop.f32.mrf.mxu0 }
 0x193   : > { %1272 = vst [vmem:[%s2242_s5 + $0x98] sm:$0xff] %v1247_v15  ;;  %v1228_v30 = vmax.f32 %v1153_v45, 0.0 }
 0x195   : > { %1253 = vst [vmem:[%s2242_s5] sm:$0xff] %v1228_v30 }
 0x1a8   : > { %v1192_v22 = vpop.f32.mrf.mxu2 }
 0x1a9   : > { %v1241_v20 = vmax.f32 %v1192_v22, 0.0 }
 0x1ab   : > { %1266 = vst [vmem:[%s2242_s5 + $0x68] sm:$0xff] %v1241_v20 }
 0x1b0   : > { %v1195_v11 = vpop.f32.mrf.mxu2 }
 0x1b1   : > { %v1242_v13 = vmax.f32 %v1195_v11, 0.0 }
 0x1b3   : > { %1267 = vst [vmem:[%s2242_s5 + $0x70] sm:$0xff] %v1242_v13 }
 0x1b4   : > { %v1171_v34 = vpop.f32.mrf.mxu1 }
 0x1b5   : > { %v1234_v40 = vmax.f32 %v1171_v34, 0.0 }
 0x1b7   : > { %1259 = vst [vmem:[%s2242_s5 + $0x30] sm:$0xff] %v1234_v40 }
 0x1ba   : > { %v1213_v27 = vpop.f32.mrf.mxu3 }
 0x1bb   : > { %v1248_v24 = vmax.f32 %v1213_v27, 0.0 }
 0x1bc   : > { %v1174_v41 = vpop.f32.mrf.mxu1 }
 0x1bd   : > { %1273 = vst [vmem:[%s2242_s5 + $0xa0] sm:$0xff] %v1248_v24  ;;  %v1235_v53 = vmax.f32 %v1174_v41, 0.0 }
 0x1bf   : > { %1260 = vst [vmem:[%s2242_s5 + $0x38] sm:$0xff] %v1235_v53 }
 0x1c4   : > { %v1177_v6 = vpop.f32.mrf.mxu1 }
 0x1c5   : > { %v1236_v10 = vmax.f32 %v1177_v6, 0.0  ;;  %v1198_v58 = vpop.f32.mrf.mxu2 }
 0x1c6   : > { %v1243_v61 = vmax.f32 %v1198_v58, 0.0  ;;  %v1156_v19 = vpop.f32.mrf.mxu0 }
 0x1c7   : > { %1261 = vst [vmem:[%s2242_s5 + $0x40] sm:$0xff] %v1236_v10  ;;  %v1229_v28 = vmax.f32 %v1156_v19, 0.0 }
 0x1c8   : > { %1268 = vst [vmem:[%s2242_s5 + $0x78] sm:$0xff] %v1243_v61 }
 0x1c9   : > { %1254 = vst [vmem:[%s2242_s5 + $0x8] sm:$0xff] %v1229_v28 }
 0x1cc   : > { %v1180_v46 = vpop.f32.mrf.mxu1 }
 0x1cd   : > { %v1237_v26 = vmax.f32 %v1180_v46, 0.0 }
 0x1cf   : > { %1262 = vst [vmem:[%s2242_s5 + $0x48] sm:$0xff] %v1237_v26 }
 0x1d4   : > { %v1216_v7 = vpop.f32.mrf.mxu3 }
 0x1d5   : > { %v1249_v49 = vmax.f32 %v1216_v7, 0.0 }
 0x1d6   : > { %v1159_v5 = vpop.f32.mrf.mxu0 }
 0x1d7   : > { %1274 = vst [vmem:[%s2242_s5 + $0xa8] sm:$0xff] %v1249_v49  ;;  %v1230_v57 = vmax.f32 %v1159_v5, 0.0 }
 0x1d9   : > { %1255 = vst [vmem:[%s2242_s5 + $0x10] sm:$0xff] %v1230_v57 }
 0x1dc   : > { %v1219_v32 = vpop.f32.mrf.mxu3 }
 0x1dd   : > { %v1250_v23 = vmax.f32 %v1219_v32, 0.0 }
 0x1de   : > { %v1162_v60 = vpop.f32.mrf.mxu0 }
 0x1df   : > { %1275 = vst [vmem:[%s2242_s5 + $0xb0] sm:$0xff] %v1250_v23  ;;  %v1231_v14 = vmax.f32 %v1162_v60, 0.0 }
 0x1e1   : > { %1256 = vst [vmem:[%s2242_s5 + $0x18] sm:$0xff] %v1231_v14 }
 0x1e4   : > { %v1201_v56 = vpop.f32.mrf.mxu2 }
 0x1e5   : > { %v1244_v1 = vmax.f32 %v1201_v56, 0.0 }
 0x1e6   : > { %v1165_v59 = vpop.f32.mrf.mxu0 }
 0x1e7   : > { %1269 = vst [vmem:[%s2242_s5 + $0x80] sm:$0xff] %v1244_v1  ;;  %v1232_v37 = vmax.f32 %v1165_v59, 0.0 }
 0x1e9   : > { %1257 = vst [vmem:[%s2242_s5 + $0x20] sm:$0xff] %v1232_v37 }
 0x1ef   : > { %v1222_v29 = vpop.f32.mrf.mxu3 }
 0x1f0   : > { %v1251_v55 = vmax.f32 %v1222_v29, 0.0 }
 0x1f2   : > { %1276 = vst [vmem:[%s2242_s5 + $0xb8] sm:$0xff] %v1251_v55 }
 0x1f6   : > { %v1204_v33 = vpop.f32.mrf.mxu2 }
 0x1f7   : > { %v1245_v18 = vmax.f32 %v1204_v33, 0.0  ;;  %v1225_v8 = vpop.f32.mrf.mxu3 }
 0x1f8   : > { %v1252_v2 = vmax.f32 %v1225_v8, 0.0 }
 0x1f9   : > { %1270 = vst [vmem:[%s2242_s5 + $0x88] sm:$0xff] %v1245_v18 }
 0x1fa   : > { %1277 = vst [vmem:[%s2242_s5 + $0xc0] sm:$0xff] %v1252_v2 }
 0x201   : > { %v1207_v36 = vpop.f32.mrf.mxu2 }
 0x202   : > { %v1246_v42 = vmax.f32 %v1207_v36, 0.0  ;;  %v1183_v25 = vpop.f32.mrf.mxu1 }
 0x203   : > { %v1238_v43 = vmax.f32 %v1183_v25, 0.0 }
 0x204   : > { %1271 = vst [vmem:[%s2242_s5 + $0x90] sm:$0xff] %v1246_v42 }
 0x205   : > { %1263 = vst [vmem:[%s2242_s5 + $0x50] sm:$0xff] %v1238_v43 }
 0x20a   : > { %v1168_v3 = vpop.f32.mrf.mxu0  ;;  %v1186_v21 = vpop.f32.mrf.mxu1 }
 0x20b   : > { %v1233_v47 = vmax.f32 %v1168_v3, 0.0  ;;  %v1239_v51 = vmax.f32 %v1186_v21, 0.0 }
 0x20d   : > { %1258 = vst [vmem:[%s2242_s5 + $0x28] sm:$0xff] %v1233_v47 }
 0x20e   : > { %1264 = vst [vmem:[%s2242_s5 + $0x58] sm:$0xff] %v1239_v51 }
 0x20f   : > { %1541 = shalt.err (!%p1538_p5)
}
 0x210   : > { %s1581_s8 = smov 128   ;;  %s1582_s29 = smov 256  }
 0x211   : > { %s1583_s30 = smov 8  }
 0x212   : > { %1420 = dma.vmem_to_hbm [thread:$0]  (%p1647_p6), %s1291_s11, 3200, %s1293_s12, %s1279_s19, %s1581_s8, %s1582_s29, %s1583_s30  }
 0x213 PF: > { %s1307_s5 = sand.u32 1, %s1564_s15   ;;  %p1423_p7 = pnand %p1363_p9, %p1651_p8 }
 0x214   : > { %s1308_s9 = scalar_lea.sflag [#allocation4], %s1307_s5 }
 0x215   : > { %p1424_p10 = pneg %p1423_p7 }
 0x217   : > { %1559 = dma.done.wait (%p1424_p10), %s1308_s9, 3200  }
 0x218   : > { %1561 = vsyncadd (%p1424_p10), %s1308_s9, 4294964096  ;;  %p14_p11 = scmp.ge.s32.totalorder %s1632_s21, 4   ;;  %s2321_s15 = smov %s1568_s16 }
 0x219   : > { %s2322_s16 = smov %s1572_s17  ;;  %s2323_s17 = smov %s1645_s24 }
 0x21a   : > { %s2324_s18 = smov %s1632_s21  ;;  %16 = sbr.rel (!%p14_p11) target bundleno = 3 (0x3), region = 114 }
 0x21f   :  { %1314 = vsyncpa [#allocation4], 1 }
 0x220   :  { %1316 = vsyncpa [#allocation4 + $0x1], 1 }

</bundles_post_ra>
